<compile_context>
chip_gen: v5e
topology: v5e:2x2
jax: 0.10.0
libtpu: 0.0.40
codegen_flags: <defaults>
</compile_context>

<pallas_src>
import jax
import jax.numpy as jnp
from jax.experimental import pallas as pl
from jax.experimental.pallas import tpu as pltpu

NUM_FEATURES = 3
HIDDEN_SIZE = 20
OUTPUT_SIZE = 5

_LANES = 128  # TPU vreg lane width


def mlp_kernel(x_ref, w1_ref, b1_ref, w2_ref, b2_ref, o_ref):
    # x tile: (F, TB) f32, batch on the lane axis.
    x = x_ref[...]

    # fc1: (H, F) @ (F, TB) -> (H, TB) on the MXU; bias + ReLU on the VPU.
    h = jnp.dot(w1_ref[...], x, preferred_element_type=jnp.float32) + b1_ref[...]
    h = jnp.maximum(h, 0.0)

    # out layer: (O, H) @ (H, TB) -> (O, TB) on the MXU.
    logits = jnp.dot(w2_ref[...], h, preferred_element_type=jnp.float32) + b2_ref[...]

    # Numerically stable softmax over the class (sublane) axis.
    m = jnp.max(logits, axis=0, keepdims=True)
    e = jnp.exp(logits - m)
    denom = jnp.sum(e, axis=0, keepdims=True)
    # NOTE: output kept f32 to match the PyTorch module exactly; switch o_ref /
    # out_shape to bf16 if the consumer tolerates it (halves the dominant write).
    o_ref[...] = (e / denom).astype(o_ref.dtype)


def _choose_batch_tile(B: int, tile_b: int) -> int:
    """Lane-axis batch tile: lane-aligned partial blocks, and >=2 grid steps when
    the batch is big enough (v7x has 2 TensorCores; batch axis is 'parallel')."""
    if B <= max(tile_b, _LANES):
        if B >= 2 * _LANES:
            return pl.cdiv(pl.cdiv(B, 2), _LANES) * _LANES
        return B  # single block covering the full batch (block dim == array dim)
    return max(_LANES, (min(tile_b, B) // _LANES) * _LANES)


def mlp_forward(x, w1, b1, w2, b2, *, tile_b=32768):
    """x: (B, F) f32.  w1: (H, F), b1: (H,), w2: (O, H), b2: (O,) — PyTorch layout.
    Returns softmax probabilities with shape (B, O), matching the nn.Module."""
    B = x.shape[0]
    tb = _choose_batch_tile(B, tile_b)
    grid = (pl.cdiv(B, tb),)

    # Layout plumbing: put the batch on the lane axis.  (A consumer that can take
    # the (O, B) layout directly can skip the final .T below.)
    x_t = x.T.astype(jnp.float32)                        # (F, B)
    w1f = w1.astype(jnp.float32)                         # (H, F) — already MXU LHS layout
    w2f = w2.astype(jnp.float32)                         # (O, H)
    b1c = b1.reshape(HIDDEN_SIZE, 1).astype(jnp.float32)
    b2c = b2.reshape(OUTPUT_SIZE, 1).astype(jnp.float32)

    out_t = pl.pallas_call(
        mlp_kernel,
        out_shape=jax.ShapeDtypeStruct((OUTPUT_SIZE, B), jnp.float32),
        grid=grid,
        in_specs=[
            pl.BlockSpec((NUM_FEATURES, tb), lambda i: (0, i)),            # x tile (streamed)
            pl.BlockSpec((HIDDEN_SIZE, NUM_FEATURES), lambda i: (0, 0)),   # w1 (resident)
            pl.BlockSpec((HIDDEN_SIZE, 1), lambda i: (0, 0)),              # b1 (resident)
            pl.BlockSpec((OUTPUT_SIZE, HIDDEN_SIZE), lambda i: (0, 0)),    # w2 (resident)
            pl.BlockSpec((OUTPUT_SIZE, 1), lambda i: (0, 0)),              # b2 (resident)
        ],
        out_specs=pl.BlockSpec((OUTPUT_SIZE, tb), lambda i: (0, i)),
        compiler_params=pltpu.CompilerParams(
            dimension_semantics=("parallel",),
            vmem_limit_bytes=48 * 1024 * 1024,
        ),
    )(x_t, w1f, b1c, w2f, b2c)

    return out_t.T  # (B, O), same as the PyTorch forward


def init_params(key):
    # Deterministic PyTorch-style uniform(-1/sqrt(fan_in), 1/sqrt(fan_in)) init.
    k1, k2, k3, k4 = jax.random.split(key, 4)
    bound1 = 1.0 / (NUM_FEATURES ** 0.5)
    bound2 = 1.0 / (HIDDEN_SIZE ** 0.5)
    w1 = jax.random.uniform(k1, (HIDDEN_SIZE, NUM_FEATURES), jnp.float32, -bound1, bound1)
    b1 = jax.random.uniform(k2, (HIDDEN_SIZE,), jnp.float32, -bound1, bound1)
    w2 = jax.random.uniform(k3, (OUTPUT_SIZE, HIDDEN_SIZE), jnp.float32, -bound2, bound2)
    b2 = jax.random.uniform(k4, (OUTPUT_SIZE,), jnp.float32, -bound2, bound2)
    return w1, b1, w2, b2


if __name__ == "__main__":
    key = jax.random.PRNGKey(0)
    k_x, k_p = jax.random.split(key)
    batch = 256
    x = jax.random.normal(k_x, (batch, NUM_FEATURES), jnp.float32)
    w1, b1, w2, b2 = init_params(k_p)

    # Small lane-aligned tile so the multi-step pipelined grid is exercised
    # (tb = 128 -> grid = (2,)); production use keeps the large default tile.
    out = mlp_forward(x, w1, b1, w2, b2, tile_b=128)
    out = jax.block_until_ready(out)

    # Pure-JAX f32 reference of the PyTorch forward pass.
    h_ref = jnp.maximum(x @ w1.T + b1, 0.0)
    logits_ref = h_ref @ w2.T + b2
    ref = jax.nn.softmax(logits_ref, axis=-1)

    assert out.shape == (batch, OUTPUT_SIZE)
    assert jnp.allclose(out, ref, atol=2e-3, rtol=2e-3)
    # Exact divide in the kernel -> rows sum to 1 up to f32 rounding.
    assert jnp.allclose(jnp.sum(out, axis=-1), 1.0, atol=1e-4)

    print("KERNEL_OK")
</pallas_src>

<mosaic_0001>
module attributes {stable_mosaic.version = 11 : i64} {
  func.func @mlp_kernel(%arg0: i32, %arg1: memref<3x128xf32, #tpu.memory_space<vmem>>, %arg2: memref<20x3xf32, #tpu.memory_space<vmem>>, %arg3: memref<20x1xf32, #tpu.memory_space<vmem>>, %arg4: memref<5x20xf32, #tpu.memory_space<vmem>>, %arg5: memref<5x1xf32, #tpu.memory_space<vmem>>, %arg6: memref<5x128xf32, #tpu.memory_space<vmem>>) attributes {dimension_semantics = [#tpu.dimension_semantics<parallel>], iteration_bounds = array<i64: 2>, scalar_prefetch = 0 : i64, scratch_operands = 0 : i64, tpu.core_type = #tpu.core_type<tc>, window_params = [{transform_indices = @transform_0, window_bounds = array<i64: 3, 128>}, {pipeline_mode = #tpu.pipeline_mode<synchronous>, transform_indices = @transform_1, window_bounds = array<i64: 20, 3>}, {pipeline_mode = #tpu.pipeline_mode<synchronous>, transform_indices = @transform_2, window_bounds = array<i64: 20, 1>}, {pipeline_mode = #tpu.pipeline_mode<synchronous>, transform_indices = @transform_3, window_bounds = array<i64: 5, 20>}, {pipeline_mode = #tpu.pipeline_mode<synchronous>, transform_indices = @transform_4, window_bounds = array<i64: 5, 1>}, {transform_indices = @transform_5, window_bounds = array<i64: 5, 128>}]} {
    %c0 = arith.constant 0 : index
    %c0_0 = arith.constant 0 : index
    %0 = vector.load %arg1[%c0, %c0_0] : memref<3x128xf32, #tpu.memory_space<vmem>>, vector<3x128xf32>
    %c0_1 = arith.constant 0 : index
    %c0_2 = arith.constant 0 : index
    %1 = vector.load %arg2[%c0_1, %c0_2] : memref<20x3xf32, #tpu.memory_space<vmem>>, vector<20x3xf32>
    %cst = arith.constant dense<0.000000e+00> : vector<20x128xf32>
    %2 = tpu.matmul %1, %0, %cst {dimension_numbers = #tpu.dot_dimension_numbers<[1], [0], [0], [1], [0, 0, 1, 1], [], []>} : vector<20x3xf32>, vector<3x128xf32>, vector<20x128xf32> -> vector<20x128xf32>
    %c0_3 = arith.constant 0 : index
    %c0_4 = arith.constant 0 : index
    %3 = vector.load %arg3[%c0_3, %c0_4] : memref<20x1xf32, #tpu.memory_space<vmem>>, vector<20x1xf32>
    %4 = vector.broadcast %3 : vector<20x1xf32> to vector<20x128xf32>
    %5 = arith.addf %2, %4 : vector<20x128xf32>
    %cst_5 = arith.constant 0.000000e+00 : f32
    %6 = vector.broadcast %cst_5 : f32 to vector<20x128xf32>
    %7 = arith.maximumf %5, %6 : vector<20x128xf32>
    %c0_6 = arith.constant 0 : index
    %c0_7 = arith.constant 0 : index
    %8 = vector.load %arg4[%c0_6, %c0_7] : memref<5x20xf32, #tpu.memory_space<vmem>>, vector<5x20xf32>
    %cst_8 = arith.constant dense<0.000000e+00> : vector<5x128xf32>
    %9 = tpu.matmul %8, %7, %cst_8 {dimension_numbers = #tpu.dot_dimension_numbers<[1], [0], [0], [1], [0, 0, 1, 1], [], []>} : vector<5x20xf32>, vector<20x128xf32>, vector<5x128xf32> -> vector<5x128xf32>
    %c0_9 = arith.constant 0 : index
    %c0_10 = arith.constant 0 : index
    %10 = vector.load %arg5[%c0_9, %c0_10] : memref<5x1xf32, #tpu.memory_space<vmem>>, vector<5x1xf32>
    %11 = vector.broadcast %10 : vector<5x1xf32> to vector<5x128xf32>
    %12 = arith.addf %9, %11 : vector<5x128xf32>
    %cst_11 = arith.constant dense<0xFF800000> : vector<128xf32>
    %13 = vector.multi_reduction <maximumf>, %12, %cst_11 [0] : vector<5x128xf32> to vector<128xf32>
    %14 = vector.shape_cast %13 : vector<128xf32> to vector<1x128xf32>
    %15 = vector.broadcast %14 : vector<1x128xf32> to vector<5x128xf32>
    %16 = arith.subf %12, %15 : vector<5x128xf32>
    %17 = math.exp %16 : vector<5x128xf32>
    %cst_12 = arith.constant dense<0.000000e+00> : vector<128xf32>
    %18 = vector.multi_reduction <add>, %17, %cst_12 [0] : vector<5x128xf32> to vector<128xf32>
    %19 = vector.shape_cast %18 : vector<128xf32> to vector<1x128xf32>
    %20 = vector.broadcast %19 : vector<1x128xf32> to vector<5x128xf32>
    %21 = arith.divf %17, %20 : vector<5x128xf32>
    %c0_13 = arith.constant 0 : index
    %c0_14 = arith.constant 0 : index
    %22 = vector.load %arg6[%c0_13, %c0_14] : memref<5x128xf32, #tpu.memory_space<vmem>>, vector<5x128xf32>
    tpu.vector_store %arg6[%c0_13, %c0_14], %21 {strides = array<i32>} : memref<5x128xf32, #tpu.memory_space<vmem>>, vector<5x128xf32>,
    return
  }
  func.func @transform_0(%arg0: i32) -> (i32, i32) {
    %c0_i32 = arith.constant 0 : i32
    %c0_i32_0 = arith.constant 0 : i32
    return %c0_i32, %arg0 : i32, i32
  }
  func.func @transform_1(%arg0: i32) -> (i32, i32) {
    %c0_i32 = arith.constant 0 : i32
    %c0_i32_0 = arith.constant 0 : i32
    %c0_i32_1 = arith.constant 0 : i32
    return %c0_i32, %c0_i32_0 : i32, i32
  }
  func.func @transform_2(%arg0: i32) -> (i32, i32) {
    %c0_i32 = arith.constant 0 : i32
    %c0_i32_0 = arith.constant 0 : i32
    %c0_i32_1 = arith.constant 0 : i32
    return %c0_i32, %c0_i32_0 : i32, i32
  }
  func.func @transform_3(%arg0: i32) -> (i32, i32) {
    %c0_i32 = arith.constant 0 : i32
    %c0_i32_0 = arith.constant 0 : i32
    %c0_i32_1 = arith.constant 0 : i32
    return %c0_i32, %c0_i32_0 : i32, i32
  }
  func.func @transform_4(%arg0: i32) -> (i32, i32) {
    %c0_i32 = arith.constant 0 : i32
    %c0_i32_0 = arith.constant 0 : i32
    %c0_i32_1 = arith.constant 0 : i32
    return %c0_i32, %c0_i32_0 : i32, i32
  }
  func.func @transform_5(%arg0: i32) -> (i32, i32) {
    %c0_i32 = arith.constant 0 : i32
    %c0_i32_0 = arith.constant 0 : i32
    return %c0_i32, %arg0 : i32, i32
  }
}

</mosaic_0001>

<bundles_post_ra>
// kernel: tpu_custom_call.1
= control target key start
LH: loop header
LB: loop body
LE: loop exit
PB: predicated region body
PF: predicated region fallthrough
CT: control target
= control target key end

     0   :  { %10 = vsyncpa [#allocation3], 0  ;;  %s697_s0 = inlined_call_operand.vmem [shape: f32[3,256], index: 0, kind: input, shape index: {}]   ;;  %s698_s1 = inlined_call_operand.vmem [shape: f32[20,3], index: 1, kind: input, shape index: {}]   ;;  %s699_s2 = inlined_call_operand.vmem [shape: f32[20,1], index: 2, kind: input, shape index: {}]   ;;  %s700_s3 = inlined_call_operand.vmem [shape: f32[5,20], index: 3, kind: input, shape index: {}]   ;;  %s701_s4 = inlined_call_operand.vmem [shape: f32[5,1], index: 4, kind: input, shape index: {}]   ;;  %s702_s5 = inlined_call_operand.hbm [shape: f32[5,256], index: 5, kind: output, shape index: {}]  }
   0x1   :  { %12 = vsyncpa [#allocation3 + $0x1], 0  ;;  %s588_s18 = smov 0   ;;  %s590_s19 = smov 0  }
   0x2   :  { %s592_s20 = smov 0   ;;  %s594_s21 = smov 0  }
   0x3 LB: > { %s609_s22 = sadd.s32 4294967295, %s555_s21   ;;  %s429_s23 = sadd.s32 4294967294, %s555_s21   ;;  %s555_s21 = sphi %s594_s21, %s708_s21   ;;  %s551_s20 = sphi %s592_s20, %s707_s20   ;;  %s547_s19 = sphi %s590_s19, %s706_s19   ;;  %s543_s18 = sphi %s588_s18, %s705_s18  }
   0x4   : > { %s613_s24 = sadd.s32 1, %s555_s21   ;;  %s135_s25 = sadd.s32 1, %s551_s20 }
   0x5   : > { %s132_s26 = ssub.s32 %s555_s21, %s613_s24  ;;  %p145_p0 = scmp.ne.s32.totalorder %s551_s20, %s547_s19 }
   0x6   : > { %p133_p1 = scmp.eq.s32.totalorder %s132_s26, 0  ;;  %p146_p2 = scmp.eq.s32.totalorder %s609_s22, 1 }
   0x7   : > { %p151_p3 = scmp.ne.s32.totalorder %s547_s19, %s543_s18  ;;  %p152_p4 = scmp.eq.s32.totalorder %s429_s23, 1 }
   0x8   : > { %s624_s27 = scalar_select %p133_p1, %s551_s20, %s135_s25  }
   0x9   : > { %p626_p5 = por %p146_p2, %p145_p0  ;;  %p630_p6 = por %p152_p4, %p151_p3 }
   0xa   : > { %p432_p7 = scmp.ge.s32.totalorder %s555_s21, 1  ;;  %p189_p8 = scmp.lt.s32.totalorder %s555_s21, 3 }
   0xc   : > { %p190_p9 = pnand %p432_p7, %p189_p8 }
   0xd   : > { %p216_p10 = scmp.lt.s32.totalorder (!%p190_p9), %s609_s22, 1  ;;  %s442_s12 = sshll.u32 (!%p190_p9), %s609_s22, 3 }
   0xe   : > { %193 = sbr.rel (%p190_p9) target bundleno = 353 (0x161), region = 40  ;;  %s365_s15 = scalar_lea.hbm (!%p190_p9), %s702_s5, %s442_s12 }
   0xf   : > { %s369_s23 = sshll.u32 (!%p190_p9), %s365_s15, 4  ;;  %s370_s23 = int_to_ptr.hbm [resolvable:$true] %s369_s23 }
  0x10   : > { %s507_s25 = sshra.s32 (!%p190_p9), %s370_s23, 4  ;;  %s508_s25 = int_to_ptr.hbm [resolvable:$true] %s507_s25 }
  0x11   : > { %s509_s26 = scalar_lea.hbm (!%p190_p9), %s508_s25, 8  ;;  %p514_p0 = scmp.lt.s32.totalorder (!%p190_p9), %s508_s25, %s702_s5 }
  0x12   : > { %p510_p11 = scmp.ne.s32.totalorder (!%p190_p9), %s508_s25, %s509_s26 }
  0x13   : > { %v226_v0 = vld [vmem:[%s699_s2 + $0x10] sm:$0xf]  ;;  %s217_s7 = scalar_select %p216_p10, %s609_s22, 1  ;;  %v557_v1 = vmov 0   ;;  %v224_v2 = vld [vmem:[%s699_s2] sm:$0xff]  ;;  %vm252_vm0 = vcmask 1042432  }
  0x14   : > { %487 = vset.pattern.permute.xlu0 %v557_v1  ;;  %488 = vset.pattern.permute.xlu1 %v557_v1  ;;  %v222_v3 = vld [vmem:[%s698_s1 + $0x8] sm:$0xff]  ;;  %vm242_vm1 = vcmask 23552   ;;  %v223_v4 = vld [vmem:[%s698_s1 + $0x10] sm:$0xf]  ;;  %v221_v6 = vld [vmem:[%s698_s1] sm:$0xff]  ;;  %vm296_vm2 = vcmask 1043456   ;;  %p511_p12 = pnand %p510_p11, %p626_p5 }
  0x15   : > { %239 = vperm.xlu0 %487, %v226_v0   ;;  %229 = vperm.xlu1 %488, %v224_v2   ;;  %s434_s10 = sshll.u32 %s217_s7, 2  ;;  %v225_v7 = vld [vmem:[%s699_s2 + $0x8] sm:$0xff]  ;;  %v286_v8 = vld [vmem:[%s701_s4] sm:$0x1f]  ;;  %vm292_vm3 = vcmask 162816   ;;  %vm320_vm4 = vcmask 1044480  }
  0x16   : > { %s219_s13 = scalar_lea.vmem %s697_s0, %s434_s10  ;;  %v285_v21 = vld [vmem:[%s700_s3] sm:$0x1f]  ;;  %s213_s10 = sand.u32 1, %s547_s19  }
  0x17   : > { %v220_v5 = vld [vmem:[%s219_s13] sm:$0x7]  ;;  %s433_s11 = sshll.u32 %s213_s10, 3  ;;  %s355_s22 = scalar_lea.sflag [#allocation3], %s213_s10 }
  0x18   : > { %445 = vmatpush.msk.msra.mxu2 %vm252_vm0, %v220_v5  ;;  %446 = vmatpush.msk.msra.mxu3 %vm252_vm0, %v220_v5  ;;  %s215_s16 = scalar_lea.vmem [#allocation2], %s433_s11  ;;  %p512_p13 = pneg %p511_p12 }
  0x19   : > { %437 = vmatmul.msk.f32.vlgmr.msra.gmra.mxu2 %vm242_vm1, %v222_v3  ;;  %438 = vmatmul.msk.f32.vlgmr.msra.gmra.mxu3 %vm242_vm1, %v223_v4  ;;  %s367_s17 = sshll.u32 %s215_s16, 4  ;;  %s513_s7 = scalar_lea.hbm %s702_s5, 16  ;;  %s368_s17 = int_to_ptr.vmem [resolvable:$true] %s367_s17 }
  0x1a   : > { %435 = vmatpush.msk.msra.mxu0 %vm252_vm0, %v220_v5  ;;  %p515_p1 = scmp.lt.s32.totalorder %s513_s7, %s509_s26 }
  0x1b   : > { %436 = vmatmul.msk.f32.vlgmr.msra.gmra.mxu0 %vm242_vm1, %v221_v6 }
  0x1c   : > { %p516_p2 = por %p515_p1, %p514_p0 }
  0x1d   : > { %234 = vperm.xlu0 %487, %v225_v7   ;;  %289 = vperm.xlu1 %488, %v286_v8  }
  0x1e   : > { %p517_p3 = pnand %p516_p2, %p512_p13 }
  0x87   : > { %v240_v9 = vpop.permute.xlu0 %239  ;;  %v230_v12 = vpop.permute.xlu1 %229 }
  0x8f   : > { %v235_v11 = vpop.permute.xlu0 %234  ;;  %v290_v22 = vpop.permute.xlu1 %289 }
  0x98   : > { %v273_v10 = vpop.f32.mrf.mxu0 }
  0x99   : > { %v274_v17 = vadd.f32 %v273_v10, %v230_v12 }
  0x9b   : > { %v282_v20 = vmax.f32 %v274_v17, 0.0 }
  0x9c   : > { %v276_v13 = vpop.f32.mrf.mxu2  ;;  %v279_v14 = vpop.f32.mrf.mxu3 }
  0x9d   : > { %v277_v15 = vadd.f32 %v276_v13, %v235_v11  ;;  %v280_v16 = vadd.f32 %v279_v14, %v240_v9 }
  0x9f   : > { %v284_v18 = vmax.f32 %v280_v16, 0.0  ;;  %v283_v19 = vmax.f32 %v277_v15, 0.0 }
  0xa1   : > { %439 = vmatpush.msk.msra.mxu1 %vm296_vm2, %v284_v18 }
  0xa3   : > { %314 = vmatpush.msra.mxu1 %v283_v19 }
  0xa5   : > { %315 = vmatpush.msra.mxu1 %v282_v20 }
  0xa6   : > { %440 = vmatmul.msk.f32.vlgmr.msra.gmra.mxu1 %vm292_vm3, %v285_v21 }
 0x123   : > { %v317_v23 = vpop.f32.mrf.mxu1 }
 0x124   : > { %v318_v24 = vadd.f32 %v317_v23, %v290_v22 }
 0x126   : > { %v321_v25 = vsel %vm320_vm4, %v318_v24, -inf }
 0x127   : > { %v322_v26 = vrot.slane %v321_v25, 4 }
 0x129   : > { %v323_v27 = vmax.f32 %v321_v25, %v322_v26 }
 0x12b   : > { %v324_v28 = vrot.slane %v323_v27, 2 }
 0x12d   : > { %v325_v29 = vmax.f32 %v323_v27, %v324_v28 }
 0x12f   : > { %v326_v30 = vrot.slane %v325_v29, 1 }
 0x131   : > { %v327_v31 = vmax.f32 %v325_v29, %v326_v30 }
 0x133   : > { %v328_v32 = vsub.f32 %v318_v24, %v327_v31 }
 0x135   : > { %v329_v33 = vmul.f32 1.442695, %v328_v32 }
 0x137   : > { %489 = vpow2.f32 %v329_v33 }
 0x13d   : > { %v490_v34 = vpop.eup %489 }
 0x13e   : > { %v331_v35 = vsel %vm320_vm4, %v490_v34, 0.0 }
 0x13f   : > { %v332_v36 = vrot.slane %v331_v35, 4 }
 0x141   : > { %v333_v37 = vadd.f32 %v332_v36, %v331_v35 }
 0x143   : > { %v334_v38 = vrot.slane %v333_v37, 2 }
 0x145   : > { %v335_v39 = vadd.f32 %v334_v38, %v333_v37 }
 0x147   : > { %v336_v40 = vrot.slane %v335_v39, 1 }
 0x149   : > { %v337_v41 = vadd.f32 %v336_v40, %v335_v39 }
 0x14b   : > { %491 = vrcp.f32 %v337_v41  ;;  %v349_v45 = vand.u32 2147483648, %v337_v41  ;;  %v347_v47 = vand.u32 2147483647, %v337_v41  ;;  %vm343_vm6 = vweird.f32 %v337_v41 }
 0x14d   : > { %v350_v49 = vor.u32 1.1754944e-38, %v349_v45  ;;  %vm348_vm8 = vcmp.eq.f32.partialorder %v347_v47, 8.507059e+37 }
 0x151   : > { %v492_v42 = vpop.eup %491 }
 0x152   : > { %v339_v43 = vmul.f32 %v492_v42, %v337_v41  ;;  %vm344_vm5 = vweird.f32 %v492_v42 }
 0x153   : > { %vm345_vm7 = vmor %vm343_vm6, %vm344_vm5 }
 0x154   : > { %v340_v44 = vsub.f32 1.0, %v339_v43 }
 0x156   : > { %v341_v46 = vmul.f32 %v492_v42, %v340_v44 }
 0x158   : > { %v342_v48 = vadd.f32 %v492_v42, %v341_v46 }
 0x15a   : > { %v346_v50 = vsel %vm345_vm7, %v492_v42, %v342_v48 }
 0x15b   : > { %v351_v51 = vsel %vm348_vm8, %v350_v49, %v346_v50 }
 0x15c   : > { %v352_v52 = vmul.f32 %v490_v34, %v351_v51 }
 0x15e   : > { %353 = vst [vmem:[%s215_s16] sm:$0x1f] %v352_v52 }
 0x15f   : > { %520 = shalt.err (!%p517_p3)
}
 0x160   : > { %447 = dma.vmem_to_hbm [thread:$0]  (%p626_p5), %s368_s17, 128, %s370_s23, %s355_s22  }
 0x161 PF: > { %p453_p4 = scmp.ge.s32.totalorder %s555_s21, 2  ;;  %s381_s10 = sand.u32 1, %s543_s18  }
 0x162   : > { %s382_s11 = scalar_lea.sflag [#allocation3], %s381_s10 }
 0x163   : > { %p450_p7 = pnand %p453_p4, %p630_p6 }
 0x165   : > { %p451_p8 = pneg %p450_p7 }
 0x167   : > { %538 = dma.done.wait (%p451_p8), %s382_s11, 128  }
 0x168   : > { %540 = vsyncadd (%p451_p8), %s382_s11, 4294967168  ;;  %p15_p9 = scmp.ge.s32.totalorder %s613_s24, 4   ;;  %s705_s18 = smov %s547_s19 }
 0x169   : > { %s706_s19 = smov %s551_s20  ;;  %s707_s20 = smov %s624_s27 }
 0x16a   : > { %s708_s21 = smov %s613_s24  ;;  %17 = sbr.rel (!%p15_p9) target bundleno = 3 (0x3), region = 75 }
 0x16f   :  { %388 = vsyncpa [#allocation3], 1 }
 0x170   :  { %390 = vsyncpa [#allocation3 + $0x1], 1 }

</bundles_post_ra>
